<compile_context>
chip_gen: v7x
topology: tpu7x:2x2x1
jax: 0.10.0
libtpu: 0.0.40
codegen_flags: <defaults>
</compile_context>

<pallas_src>
import functools

import jax
import jax.numpy as jnp
from jax.experimental import pallas as pl
from jax.experimental.pallas import tpu as pltpu


def _cross_attn_kernel(a_ref, b_ref, abias_ref, bbias_ref,
                       wa0_ref, wa1_ref, wa3_ref, wb0_ref, wb1_ref, bias_ref,
                       out_a_ref, out_b_ref, *, mxu_dtype):
    f32 = jnp.float32
    a = a_ref[...]                    # (Bt, La, F)
    b = b_ref[...]                    # (Bt, Lb, F)
    mask_bias_a = abias_ref[...]      # (Bt, 1, La) additive: 0 valid / -1e9 masked
    mask_bias_b = bbias_ref[...]      # (Bt, 1, Lb)

    a_mx = a.astype(mxu_dtype)        # no-op if inputs already arrive in mxu_dtype
    b_mx = b.astype(mxu_dtype)

    # Single score matmul; the column path reuses the same tile via one XLU
    # transpose instead of a second b x a^T MXU matmul.
    s = jnp.einsum("bqf,bkf->bqk", a_mx, b_mx, preferred_element_type=f32)
    s_t = jnp.swapaxes(s, 1, 2)       # (Bt, Lb, La) — XLU, MXU left free

    # Row softmax over Lb (mask from b); masking is a single vadd.
    row_logits = s + mask_bias_b
    row_logits = row_logits - jnp.max(row_logits, axis=-1, keepdims=True)
    row_e = jnp.exp(row_logits)
    row_attn = row_e * pl.reciprocal(jnp.sum(row_e, axis=-1, keepdims=True),
                                     approx=True)

    # Col softmax over La (mask from a).
    col_logits = s_t + mask_bias_a
    col_logits = col_logits - jnp.max(col_logits, axis=-1, keepdims=True)
    col_e = jnp.exp(col_logits)
    col_attn = col_e * pl.reciprocal(jnp.sum(col_e, axis=-1, keepdims=True),
                                     approx=True)

    # Probabilities cast to mxu_dtype for the MXU (standard flash practice).
    attn_a = jnp.einsum("bqk,bkf->bqf", row_attn.astype(mxu_dtype), b_mx,
                        preferred_element_type=f32)
    attn_b = jnp.einsum("bkq,bqf->bkf", col_attn.astype(mxu_dtype), a_mx,
                        preferred_element_type=f32)

    Bt, La, F = a.shape
    Lb = b.shape[1]
    H = bias_ref.shape[-1]

    # Flatten (Bt, L, F) -> (Bt*L, F): layout-free because La/Lb are sublane
    # multiples (wrapper pads if needed); plain 2-D MXU matmuls fill better
    # than Bt tiny batched matmuls.
    a2 = a.reshape(Bt * La, F)
    b2 = b.reshape(Bt * Lb, F)
    attn_a2 = attn_a.reshape(Bt * La, F)
    attn_b2 = attn_b.reshape(Bt * Lb, F)
    prod_a = a2 * attn_a2

    def mm(x, w_ref):
        return jnp.dot(x.astype(mxu_dtype), w_ref[...], preferred_element_type=f32)

    # Folded projection: diff terms are absorbed into the weights (wrapper):
    #   proj_a = a@(W0+W2) + attn_a@(W1-W2) + (a*attn_a)@W3
    #   proj_b = b@(W0+W2+W3) + attn_b@(W1-W2-W3)   (module concats diff_b twice)
    proj_a = mm(a2, wa0_ref) + mm(attn_a2, wa1_ref) + mm(prod_a, wa3_ref)
    proj_b = mm(b2, wb0_ref) + mm(attn_b2, wb1_ref)

    bias = bias_ref[...]              # (1, H) f32
    out_a = jnp.maximum(proj_a + bias, 0.0)
    out_b = jnp.maximum(proj_b + bias, 0.0)

    # Stores at the true output width H (no lane padding / wrapper slice pass).
    out_a_ref[...] = out_a.reshape(Bt, La, H).astype(out_a_ref.dtype)
    out_b_ref[...] = out_b.reshape(Bt, Lb, H).astype(out_b_ref.dtype)


def prepare_cross_attention_params(w_t, bias, *, mxu_dtype=jnp.float32):
    """One-time weight preprocessing (hoist out of the per-call path).

    w_t: (4F, H) = PyTorch Linear.weight.T; bias: (H,).
    Folds the ESIM concat ([x, attn, diff, prod] for a; [x, attn, diff, diff]
    for b) algebraically into 5 (F, H) weight slices.
    mxu_dtype=bfloat16 is valid on v5e/v6e/v7x (MXU bf16); softmax/elementwise
    math stays f32 in the kernel either way.
    """
    F4, H = w_t.shape
    F = F4 // 4
    w0 = w_t[0 * F:1 * F]
    w1 = w_t[1 * F:2 * F]
    w2 = w_t[2 * F:3 * F]
    w3 = w_t[3 * F:4 * F]
    wa0 = w0 + w2              # multiplies a
    wa1 = w1 - w2              # multiplies attn_a
    wa3 = w3                   # multiplies a * attn_a
    wb0 = w0 + w2 + w3         # multiplies b        (diff_b used twice)
    wb1 = w1 - w2 - w3         # multiplies attn_b
    ws = (wa0, wa1, wa3, wb0, wb1)
    if mxu_dtype != jnp.float32:
        ws = tuple(w.astype(mxu_dtype) for w in ws)
    bias2 = jnp.asarray(bias, jnp.float32).reshape(1, H)
    return ws + (bias2,)


def _vmem_limit_and_two_tc():
    # Generation-aware VMEM budgeting: v7x has 64 MiB/TensorCore (and 2 TCs),
    # v5e/v6e have 128 MiB (1 TC). Conservative default if detection fails.
    cap = 64 * 1024 * 1024
    try:
        info = pltpu.get_tpu_info()
        cap = int(getattr(info, "vmem_capacity_bytes", cap))
    except Exception:
        pass
    two_tc = cap <= 64 * 1024 * 1024          # 64 MiB/TC => v7x-like (2 TCs)
    limit = min((cap * 3) // 4, 96 * 1024 * 1024)
    return limit, two_tc


def _pick_block_b(B, La, Lb, F, H, budget_bytes, two_tc):
    # Byte-accurate per-batch-item footprint of one grid step:
    #   double-buffered in/out tiles + live f32 intermediates.
    bytes_per_item = 4 * (
        2 * (La * F + Lb * F + La + Lb + La * H + Lb * H)   # pipelined I/O (x2 buffers)
        + 4 * La * Lb                                       # score / prob tiles
        + 3 * (La + Lb) * F                                 # attn / prod intermediates
        + 2 * (La + Lb) * H)                                # projection outputs
    bt = max(1, min(B, budget_bytes // max(bytes_per_item, 1)))
    if two_tc and B >= 2:
        # >= 2 grid steps so both v7x TensorCores get work on the parallel axis.
        bt = min(bt, max(1, B // 2))
        # Prefer an even step count so neither TC idles on the last step.
        while bt > 1 and pl.cdiv(B, bt) % 2:
            bt -= 1
    return bt


def cross_attention(a, b, mask_a, mask_b, params, *, block_b=None):
    """a: (B, La, F), b: (B, Lb, F) (f32, or bf16 to halve input DMA);
       mask_*: (B, L*) bool (True = valid);
       params: output of prepare_cross_attention_params (call once at init)."""
    wa0, wa1, wa3, wb0, wb1, bias2 = params
    mxu_dtype = wa0.dtype
    B, La, F = a.shape
    Lb = b.shape[1]
    H = bias2.shape[-1]

    # Additive mask biases computed once per call (cheap (B, L) arrays).
    mbias_a = jnp.where(mask_a, 0.0, -1e9).astype(jnp.float32)[:, None, :]  # (B,1,La)
    mbias_b = jnp.where(mask_b, 0.0, -1e9).astype(jnp.float32)[:, None, :]  # (B,1,Lb)

    # Pad L to sublane multiples so in-kernel (Bt,L,F)->(Bt*L,F) reshapes are
    # layout-free; padded key positions get -1e9 bias, padded query rows are
    # sliced off after the call. No-op for aligned L.
    La0, Lb0 = La, Lb
    pad_la = (-La) % 8
    pad_lb = (-Lb) % 8
    if pad_la:
        a = jnp.pad(a, ((0, 0), (0, pad_la), (0, 0)))
        mbias_a = jnp.pad(mbias_a, ((0, 0), (0, 0), (0, pad_la)),
                          constant_values=-1e9)
        La += pad_la
    if pad_lb:
        b = jnp.pad(b, ((0, 0), (0, pad_lb), (0, 0)))
        mbias_b = jnp.pad(mbias_b, ((0, 0), (0, 0), (0, pad_lb)),
                          constant_values=-1e9)
        Lb += pad_lb

    vmem_limit, two_tc = _vmem_limit_and_two_tc()
    if block_b is None:
        weight_bytes = 2 * (5 * F * H * jnp.dtype(mxu_dtype).itemsize + 4 * H)
        budget = max(vmem_limit - weight_bytes - (4 << 20), 1 << 20)
        block_b = _pick_block_b(B, La, Lb, F, H, budget, two_tc)
    grid = (pl.cdiv(B, block_b),)

    kernel = functools.partial(_cross_attn_kernel, mxu_dtype=mxu_dtype)

    out_shape = (
        jax.ShapeDtypeStruct((B, La, H), jnp.float32),
        jax.ShapeDtypeStruct((B, Lb, H), jnp.float32),
    )
    # Constant-index weight/bias blocks: the block index never changes across
    # the grid, so the pipeline DMAs them once and keeps them VMEM-resident.
    in_specs = [
        pl.BlockSpec((block_b, La, F), lambda i: (i, 0, 0)),   # a
        pl.BlockSpec((block_b, Lb, F), lambda i: (i, 0, 0)),   # b
        pl.BlockSpec((block_b, 1, La), lambda i: (i, 0, 0)),   # mask bias a
        pl.BlockSpec((block_b, 1, Lb), lambda i: (i, 0, 0)),   # mask bias b
        pl.BlockSpec((F, H), lambda i: (0, 0)),                # W0+W2
        pl.BlockSpec((F, H), lambda i: (0, 0)),                # W1-W2
        pl.BlockSpec((F, H), lambda i: (0, 0)),                # W3
        pl.BlockSpec((F, H), lambda i: (0, 0)),                # W0+W2+W3
        pl.BlockSpec((F, H), lambda i: (0, 0)),                # W1-W2-W3
        pl.BlockSpec((1, H), lambda i: (0, 0)),                # bias
    ]
    out_specs = (
        pl.BlockSpec((block_b, La, H), lambda i: (i, 0, 0)),
        pl.BlockSpec((block_b, Lb, H), lambda i: (i, 0, 0)),
    )

    out_a, out_b = pl.pallas_call(
        kernel,
        out_shape=out_shape,
        grid=grid,
        in_specs=in_specs,
        out_specs=out_specs,
        compiler_params=pltpu.CompilerParams(
            dimension_semantics=("parallel",),
            vmem_limit_bytes=vmem_limit,
        ),
    )(a, b, mbias_a, mbias_b, wa0, wa1, wa3, wb0, wb1, bias2)

    if pad_la:
        out_a = out_a[:, :La0]
    if pad_lb:
        out_b = out_b[:, :Lb0]
    return out_a, out_b


def _reference(a, b, mask_a, mask_b, w_t, bias):
    # Pure-JAX reference mirroring the PyTorch forward (eval-mode dropout).
    s = jnp.einsum("bqf,bkf->bqk", a, b)
    row = jnp.where(mask_b[:, None, :], s, -1e9)
    row = jax.nn.softmax(row, axis=2)
    col = jnp.where(mask_a[:, None, :], jnp.swapaxes(s, 1, 2), -1e9)
    col = jax.nn.softmax(col, axis=2)
    attn_a = jnp.einsum("bqk,bkf->bqf", row, b)
    attn_b = jnp.einsum("bkq,bqf->bkf", col, a)
    a_cat = jnp.concatenate([a, attn_a, a - attn_a, a * attn_a], axis=-1)
    b_cat = jnp.concatenate([b, attn_b, b - attn_b, b - attn_b], axis=-1)
    oa = jax.nn.relu(a_cat @ w_t + bias)
    ob = jax.nn.relu(b_cat @ w_t + bias)
    return oa, ob


if __name__ == "__main__":
    key = jax.random.PRNGKey(0)
    B, La, Lb, F = 2, 8, 8, 32          # in_feat = 32
    H = F // 2

    k1, k2, k3, k4 = jax.random.split(key, 4)
    a = jax.random.normal(k1, (B, La, F), dtype=jnp.float32)
    b = jax.random.normal(k2, (B, Lb, F), dtype=jnp.float32)

    # deterministic masks: first item has last 2 positions of b masked,
    # second item has last 3 positions of a masked.
    mask_a = jnp.ones((B, La), dtype=bool).at[1, La - 3:].set(False)
    mask_b = jnp.ones((B, Lb), dtype=bool).at[0, Lb - 2:].set(False)

    # deterministic Linear(4F, F//2) params (weight stored transposed: (4F, H))
    w_t = jax.random.normal(k3, (4 * F, H), dtype=jnp.float32) * 0.05
    bias = jax.random.normal(k4, (H,), dtype=jnp.float32) * 0.05

    ref_a, ref_b = _reference(a, b, mask_a, mask_b, w_t, bias)

    # f32 path (exact up to the EUP approx-reciprocal in the softmax denom).
    params_f32 = prepare_cross_attention_params(w_t, bias)        # one-time prep
    out_a, out_b = cross_attention(a, b, mask_a, mask_b, params_f32)
    out_a, out_b = jax.block_until_ready((out_a, out_b))
    assert out_a.shape == (B, La, H) and out_b.shape == (B, Lb, H)
    assert jnp.allclose(out_a, ref_a, atol=5e-3, rtol=5e-3)
    assert jnp.allclose(out_b, ref_b, atol=5e-3, rtol=5e-3)

    # bf16-MXU fast path (valid on v5e/v6e/v7x): matmul operands in bf16,
    # f32 accumulate / softmax -> loose check.
    params_bf16 = prepare_cross_attention_params(w_t, bias, mxu_dtype=jnp.bfloat16)
    oa16, ob16 = cross_attention(a, b, mask_a, mask_b, params_bf16)
    oa16, ob16 = jax.block_until_ready((oa16, ob16))
    assert jnp.allclose(oa16, ref_a, atol=1e-1, rtol=1e-1)
    assert jnp.allclose(ob16, ref_b, atol=1e-1, rtol=1e-1)

    print("KERNEL_OK")
</pallas_src>

<mosaic_0001>
module attributes {stable_mosaic.version = 11 : i64} {
  func.func @_cross_attn_kernel(%arg0: i32, %arg1: memref<1x8x32xf32, #tpu.memory_space<vmem>>, %arg2: memref<1x8x32xf32, #tpu.memory_space<vmem>>, %arg3: memref<1x1x8xf32, #tpu.memory_space<vmem>>, %arg4: memref<1x1x8xf32, #tpu.memory_space<vmem>>, %arg5: memref<32x16xf32, #tpu.memory_space<vmem>>, %arg6: memref<32x16xf32, #tpu.memory_space<vmem>>, %arg7: memref<32x16xf32, #tpu.memory_space<vmem>>, %arg8: memref<32x16xf32, #tpu.memory_space<vmem>>, %arg9: memref<32x16xf32, #tpu.memory_space<vmem>>, %arg10: memref<1x16xf32, #tpu.memory_space<vmem>>, %arg11: memref<1x8x16xf32, #tpu.memory_space<vmem>>, %arg12: memref<1x8x16xf32, #tpu.memory_space<vmem>>) attributes {dimension_semantics = [#tpu.dimension_semantics<parallel>], iteration_bounds = array<i64: 2>, scalar_prefetch = 0 : i64, scratch_operands = 0 : i64, tpu.core_type = #tpu.core_type<tc>, window_params = [{transform_indices = @transform_0, window_bounds = array<i64: 1, 8, 32>}, {transform_indices = @transform_1, window_bounds = array<i64: 1, 8, 32>}, {transform_indices = @transform_2, window_bounds = array<i64: 1, 1, 8>}, {transform_indices = @transform_3, window_bounds = array<i64: 1, 1, 8>}, {pipeline_mode = #tpu.pipeline_mode<synchronous>, transform_indices = @transform_4, window_bounds = array<i64: 32, 16>}, {pipeline_mode = #tpu.pipeline_mode<synchronous>, transform_indices = @transform_5, window_bounds = array<i64: 32, 16>}, {pipeline_mode = #tpu.pipeline_mode<synchronous>, transform_indices = @transform_6, window_bounds = array<i64: 32, 16>}, {pipeline_mode = #tpu.pipeline_mode<synchronous>, transform_indices = @transform_7, window_bounds = array<i64: 32, 16>}, {pipeline_mode = #tpu.pipeline_mode<synchronous>, transform_indices = @transform_8, window_bounds = array<i64: 32, 16>}, {pipeline_mode = #tpu.pipeline_mode<synchronous>, transform_indices = @transform_9, window_bounds = array<i64: 1, 16>}, {transform_indices = @transform_10, window_bounds = array<i64: 1, 8, 16>}, {transform_indices = @transform_11, window_bounds = array<i64: 1, 8, 16>}]} {
    %c0 = arith.constant 0 : index
    %c0_0 = arith.constant 0 : index
    %c0_1 = arith.constant 0 : index
    %0 = vector.load %arg1[%c0, %c0_0, %c0_1] : memref<1x8x32xf32, #tpu.memory_space<vmem>>, vector<1x8x32xf32>
    %c0_2 = arith.constant 0 : index
    %c0_3 = arith.constant 0 : index
    %c0_4 = arith.constant 0 : index
    %1 = vector.load %arg2[%c0_2, %c0_3, %c0_4] : memref<1x8x32xf32, #tpu.memory_space<vmem>>, vector<1x8x32xf32>
    %c0_5 = arith.constant 0 : index
    %c0_6 = arith.constant 0 : index
    %c0_7 = arith.constant 0 : index
    %2 = vector.load %arg3[%c0_5, %c0_6, %c0_7] : memref<1x1x8xf32, #tpu.memory_space<vmem>>, vector<1x1x8xf32>
    %c0_8 = arith.constant 0 : index
    %c0_9 = arith.constant 0 : index
    %c0_10 = arith.constant 0 : index
    %3 = vector.load %arg4[%c0_8, %c0_9, %c0_10] : memref<1x1x8xf32, #tpu.memory_space<vmem>>, vector<1x1x8xf32>
    "tpu.trace_start"() <{level = 10 : i32, message = "bqf,bkf->bqk"}> : () -> ()
    %cst = arith.constant dense<0.000000e+00> : vector<1x8x8xf32>
    %4 = tpu.matmul %0, %1, %cst {dimension_numbers = #tpu.dot_dimension_numbers<[2], [2], [1], [1], [0, 0, 0, 1, 1, 1], [0], [0]>} : vector<1x8x32xf32>, vector<1x8x32xf32>, vector<1x8x8xf32> -> vector<1x8x8xf32>
    "tpu.trace_stop"() : () -> ()
    %5 = tpu.transpose %4, [0, 2, 1] : vector<1x8x8xf32> -> vector<1x8x8xf32>
    %6 = vector.broadcast %3 : vector<1x1x8xf32> to vector<1x8x8xf32>
    %7 = arith.addf %4, %6 : vector<1x8x8xf32>
    %cst_11 = arith.constant dense<0xFF800000> : vector<1x8xf32>
    %8 = vector.multi_reduction <maximumf>, %7, %cst_11 [2] : vector<1x8x8xf32> to vector<1x8xf32>
    %9 = vector.shape_cast %8 : vector<1x8xf32> to vector<1x8x1xf32>
    %10 = vector.broadcast %9 : vector<1x8x1xf32> to vector<1x8x8xf32>
    %11 = arith.subf %7, %10 : vector<1x8x8xf32>
    %12 = math.exp %11 : vector<1x8x8xf32>
    %cst_12 = arith.constant dense<0.000000e+00> : vector<1x8xf32>
    %13 = vector.multi_reduction <add>, %12, %cst_12 [2] : vector<1x8x8xf32> to vector<1x8xf32>
    %14 = vector.shape_cast %13 : vector<1x8xf32> to vector<1x8x1xf32>
    %15 = tpu.reciprocal %14 {approx = true} : vector<1x8x1xf32> -> vector<1x8x1xf32>
    %16 = vector.broadcast %15 : vector<1x8x1xf32> to vector<1x8x8xf32>
    %17 = arith.mulf %12, %16 : vector<1x8x8xf32>
    %18 = vector.broadcast %2 : vector<1x1x8xf32> to vector<1x8x8xf32>
    %19 = arith.addf %5, %18 : vector<1x8x8xf32>
    %cst_13 = arith.constant dense<0xFF800000> : vector<1x8xf32>
    %20 = vector.multi_reduction <maximumf>, %19, %cst_13 [2] : vector<1x8x8xf32> to vector<1x8xf32>
    %21 = vector.shape_cast %20 : vector<1x8xf32> to vector<1x8x1xf32>
    %22 = vector.broadcast %21 : vector<1x8x1xf32> to vector<1x8x8xf32>
    %23 = arith.subf %19, %22 : vector<1x8x8xf32>
    %24 = math.exp %23 : vector<1x8x8xf32>
    %cst_14 = arith.constant dense<0.000000e+00> : vector<1x8xf32>
    %25 = vector.multi_reduction <add>, %24, %cst_14 [2] : vector<1x8x8xf32> to vector<1x8xf32>
    %26 = vector.shape_cast %25 : vector<1x8xf32> to vector<1x8x1xf32>
    %27 = tpu.reciprocal %26 {approx = true} : vector<1x8x1xf32> -> vector<1x8x1xf32>
    %28 = vector.broadcast %27 : vector<1x8x1xf32> to vector<1x8x8xf32>
    %29 = arith.mulf %24, %28 : vector<1x8x8xf32>
    "tpu.trace_start"() <{level = 10 : i32, message = "bqk,bkf->bqf"}> : () -> ()
    %cst_15 = arith.constant dense<0.000000e+00> : vector<1x8x32xf32>
    %30 = tpu.matmul %17, %1, %cst_15 {dimension_numbers = #tpu.dot_dimension_numbers<[2], [1], [1], [2], [0, 0, 0, 1, 1, 2], [0], [0]>} : vector<1x8x8xf32>, vector<1x8x32xf32>, vector<1x8x32xf32> -> vector<1x8x32xf32>
    "tpu.trace_stop"() : () -> ()
    "tpu.trace_start"() <{level = 10 : i32, message = "bkq,bqf->bkf"}> : () -> ()
    %cst_16 = arith.constant dense<0.000000e+00> : vector<1x8x32xf32>
    %31 = tpu.matmul %29, %0, %cst_16 {dimension_numbers = #tpu.dot_dimension_numbers<[2], [1], [1], [2], [0, 0, 0, 1, 1, 2], [0], [0]>} : vector<1x8x8xf32>, vector<1x8x32xf32>, vector<1x8x32xf32> -> vector<1x8x32xf32>
    "tpu.trace_stop"() : () -> ()
    %32 = vector.shape_cast %0 : vector<1x8x32xf32> to vector<8x32xf32>
    %33 = vector.shape_cast %1 : vector<1x8x32xf32> to vector<8x32xf32>
    %34 = vector.shape_cast %30 : vector<1x8x32xf32> to vector<8x32xf32>
    %35 = vector.shape_cast %31 : vector<1x8x32xf32> to vector<8x32xf32>
    %36 = arith.mulf %32, %34 : vector<8x32xf32>
    %c0_17 = arith.constant 0 : index
    %c0_18 = arith.constant 0 : index
    %37 = vector.load %arg5[%c0_17, %c0_18] : memref<32x16xf32, #tpu.memory_space<vmem>>, vector<32x16xf32>
    %cst_19 = arith.constant dense<0.000000e+00> : vector<8x16xf32>
    %38 = tpu.matmul %32, %37, %cst_19 {dimension_numbers = #tpu.dot_dimension_numbers<[1], [0], [0], [1], [0, 0, 1, 1], [], []>} : vector<8x32xf32>, vector<32x16xf32>, vector<8x16xf32> -> vector<8x16xf32>
    %c0_20 = arith.constant 0 : index
    %c0_21 = arith.constant 0 : index
    %39 = vector.load %arg6[%c0_20, %c0_21] : memref<32x16xf32, #tpu.memory_space<vmem>>, vector<32x16xf32>
    %cst_22 = arith.constant dense<0.000000e+00> : vector<8x16xf32>
    %40 = tpu.matmul %34, %39, %cst_22 {dimension_numbers = #tpu.dot_dimension_numbers<[1], [0], [0], [1], [0, 0, 1, 1], [], []>} : vector<8x32xf32>, vector<32x16xf32>, vector<8x16xf32> -> vector<8x16xf32>
    %41 = arith.addf %38, %40 : vector<8x16xf32>
    %c0_23 = arith.constant 0 : index
    %c0_24 = arith.constant 0 : index
    %42 = vector.load %arg7[%c0_23, %c0_24] : memref<32x16xf32, #tpu.memory_space<vmem>>, vector<32x16xf32>
    %cst_25 = arith.constant dense<0.000000e+00> : vector<8x16xf32>
    %43 = tpu.matmul %36, %42, %cst_25 {dimension_numbers = #tpu.dot_dimension_numbers<[1], [0], [0], [1], [0, 0, 1, 1], [], []>} : vector<8x32xf32>, vector<32x16xf32>, vector<8x16xf32> -> vector<8x16xf32>
    %44 = arith.addf %41, %43 : vector<8x16xf32>
    %c0_26 = arith.constant 0 : index
    %c0_27 = arith.constant 0 : index
    %45 = vector.load %arg8[%c0_26, %c0_27] : memref<32x16xf32, #tpu.memory_space<vmem>>, vector<32x16xf32>
    %cst_28 = arith.constant dense<0.000000e+00> : vector<8x16xf32>
    %46 = tpu.matmul %33, %45, %cst_28 {dimension_numbers = #tpu.dot_dimension_numbers<[1], [0], [0], [1], [0, 0, 1, 1], [], []>} : vector<8x32xf32>, vector<32x16xf32>, vector<8x16xf32> -> vector<8x16xf32>
    %c0_29 = arith.constant 0 : index
    %c0_30 = arith.constant 0 : index
    %47 = vector.load %arg9[%c0_29, %c0_30] : memref<32x16xf32, #tpu.memory_space<vmem>>, vector<32x16xf32>
    %cst_31 = arith.constant dense<0.000000e+00> : vector<8x16xf32>
    %48 = tpu.matmul %35, %47, %cst_31 {dimension_numbers = #tpu.dot_dimension_numbers<[1], [0], [0], [1], [0, 0, 1, 1], [], []>} : vector<8x32xf32>, vector<32x16xf32>, vector<8x16xf32> -> vector<8x16xf32>
    %49 = arith.addf %46, %48 : vector<8x16xf32>
    %c0_32 = arith.constant 0 : index
    %c0_33 = arith.constant 0 : index
    %50 = vector.load %arg10[%c0_32, %c0_33] : memref<1x16xf32, #tpu.memory_space<vmem>>, vector<1x16xf32>
    %51 = vector.broadcast %50 : vector<1x16xf32> to vector<8x16xf32>
    %52 = arith.addf %44, %51 : vector<8x16xf32>
    %cst_34 = arith.constant 0.000000e+00 : f32
    %53 = vector.broadcast %cst_34 : f32 to vector<8x16xf32>
    %54 = arith.maximumf %52, %53 : vector<8x16xf32>
    %55 = vector.broadcast %50 : vector<1x16xf32> to vector<8x16xf32>
    %56 = arith.addf %49, %55 : vector<8x16xf32>
    %cst_35 = arith.constant 0.000000e+00 : f32
    %57 = vector.broadcast %cst_35 : f32 to vector<8x16xf32>
    %58 = arith.maximumf %56, %57 : vector<8x16xf32>
    %59 = vector.shape_cast %54 : vector<8x16xf32> to vector<1x8x16xf32>
    %c0_36 = arith.constant 0 : index
    %c0_37 = arith.constant 0 : index
    %c0_38 = arith.constant 0 : index
    %60 = vector.load %arg11[%c0_36, %c0_37, %c0_38] : memref<1x8x16xf32, #tpu.memory_space<vmem>>, vector<1x8x16xf32>
    tpu.vector_store %arg11[%c0_36, %c0_37, %c0_38], %59 {strides = array<i32>} : memref<1x8x16xf32, #tpu.memory_space<vmem>>, vector<1x8x16xf32>,
    %61 = vector.shape_cast %58 : vector<8x16xf32> to vector<1x8x16xf32>
    %c0_39 = arith.constant 0 : index
    %c0_40 = arith.constant 0 : index
    %c0_41 = arith.constant 0 : index
    %62 = vector.load %arg12[%c0_39, %c0_40, %c0_41] : memref<1x8x16xf32, #tpu.memory_space<vmem>>, vector<1x8x16xf32>
    tpu.vector_store %arg12[%c0_39, %c0_40, %c0_41], %61 {strides = array<i32>} : memref<1x8x16xf32, #tpu.memory_space<vmem>>, vector<1x8x16xf32>,
    return
  }
  func.func @transform_0(%arg0: i32) -> (i32, i32, i32) {
    %c0_i32 = arith.constant 0 : i32
    %c0_i32_0 = arith.constant 0 : i32
    %c0_i32_1 = arith.constant 0 : i32
    return %arg0, %c0_i32, %c0_i32_0 : i32, i32, i32
  }
  func.func @transform_1(%arg0: i32) -> (i32, i32, i32) {
    %c0_i32 = arith.constant 0 : i32
    %c0_i32_0 = arith.constant 0 : i32
    %c0_i32_1 = arith.constant 0 : i32
    return %arg0, %c0_i32, %c0_i32_0 : i32, i32, i32
  }
  func.func @transform_2(%arg0: i32) -> (i32, i32, i32) {
    %c0_i32 = arith.constant 0 : i32
    %c0_i32_0 = arith.constant 0 : i32
    %c0_i32_1 = arith.constant 0 : i32
    return %arg0, %c0_i32, %c0_i32_0 : i32, i32, i32
  }
  func.func @transform_3(%arg0: i32) -> (i32, i32, i32) {
    %c0_i32 = arith.constant 0 : i32
    %c0_i32_0 = arith.constant 0 : i32
    %c0_i32_1 = arith.constant 0 : i32
    return %arg0, %c0_i32, %c0_i32_0 : i32, i32, i32
  }
  func.func @transform_4(%arg0: i32) -> (i32, i32) {
    %c0_i32 = arith.constant 0 : i32
    %c0_i32_0 = arith.constant 0 : i32
    %c0_i32_1 = arith.constant 0 : i32
    return %c0_i32, %c0_i32_0 : i32, i32
  }
  func.func @transform_5(%arg0: i32) -> (i32, i32) {
    %c0_i32 = arith.constant 0 : i32
    %c0_i32_0 = arith.constant 0 : i32
    %c0_i32_1 = arith.constant 0 : i32
    return %c0_i32, %c0_i32_0 : i32, i32
  }
  func.func @transform_6(%arg0: i32) -> (i32, i32) {
    %c0_i32 = arith.constant 0 : i32
    %c0_i32_0 = arith.constant 0 : i32
    %c0_i32_1 = arith.constant 0 : i32
    return %c0_i32, %c0_i32_0 : i32, i32
  }
  func.func @transform_7(%arg0: i32) -> (i32, i32) {
    %c0_i32 = arith.constant 0 : i32
    %c0_i32_0 = arith.constant 0 : i32
    %c0_i32_1 = arith.constant 0 : i32
    return %c0_i32, %c0_i32_0 : i32, i32
  }
  func.func @transform_8(%arg0: i32) -> (i32, i32) {
    %c0_i32 = arith.constant 0 : i32
    %c0_i32_0 = arith.constant 0 : i32
    %c0_i32_1 = arith.constant 0 : i32
    return %c0_i32, %c0_i32_0 : i32, i32
  }
  func.func @transform_9(%arg0: i32) -> (i32, i32) {
    %c0_i32 = arith.constant 0 : i32
    %c0_i32_0 = arith.constant 0 : i32
    %c0_i32_1 = arith.constant 0 : i32
    return %c0_i32, %c0_i32_0 : i32, i32
  }
  func.func @transform_10(%arg0: i32) -> (i32, i32, i32) {
    %c0_i32 = arith.constant 0 : i32
    %c0_i32_0 = arith.constant 0 : i32
    %c0_i32_1 = arith.constant 0 : i32
    return %arg0, %c0_i32, %c0_i32_0 : i32, i32, i32
  }
  func.func @transform_11(%arg0: i32) -> (i32, i32, i32) {
    %c0_i32 = arith.constant 0 : i32
    %c0_i32_0 = arith.constant 0 : i32
    %c0_i32_1 = arith.constant 0 : i32
    return %arg0, %c0_i32, %c0_i32_0 : i32, i32, i32
  }
}

</mosaic_0001>

<bundles_post_ra>
// kernel: tpu_custom_call.1
= control target key start
LH: loop header
LB: loop body
LE: loop exit
PB: predicated region body
PF: predicated region fallthrough
CT: control target
= control target key end

     0   :  { %s1923_s0 = inlined_call_operand.vmem [shape: f32[2,8,32], index: 0, kind: input, shape index: {}]   ;;  %s1924_s1 = inlined_call_operand.vmem [shape: f32[2,8,32], index: 1, kind: input, shape index: {}]   ;;  %s1925_s2 = inlined_call_operand.vmem [shape: f32[2,1,8], index: 2, kind: input, shape index: {}]   ;;  %s1926_s3 = inlined_call_operand.vmem [shape: f32[2,1,8], index: 3, kind: input, shape index: {}]   ;;  %s1927_s4 = inlined_call_operand.vmem [shape: f32[32,16], index: 4, kind: input, shape index: {}]   ;;  %s1928_s5 = inlined_call_operand.vmem [shape: f32[32,16], index: 5, kind: input, shape index: {}]   ;;  %s1929_s6 = inlined_call_operand.vmem [shape: f32[32,16], index: 6, kind: input, shape index: {}]   ;;  %s1930_s7 = inlined_call_operand.vmem [shape: f32[32,16], index: 7, kind: input, shape index: {}]   ;;  %s1931_s8 = inlined_call_operand.vmem [shape: f32[32,16], index: 8, kind: input, shape index: {}]   ;;  %s1932_s9 = inlined_call_operand.vmem [shape: f32[1,16], index: 9, kind: input, shape index: {}]   ;;  %s1933_s10 = inlined_call_operand.hbm [shape: f32[2,8,16], index: 10, kind: output, shape index: {0}]   ;;  %s1934_s11 = inlined_call_operand.hbm [shape: f32[2,8,16], index: 11, kind: output, shape index: {1}]  }
   0x1   :  { %1937 = sst [smem:[#allocation8_spill]] %s1923_s0 }
   0x2   :  { %1938 = sst [smem:[#allocation9_spill]] %s1924_s1 }
   0x3   :  { %17 = vsyncpa [#allocation3], 0 }
   0x4   :  { %19 = vsyncpa [#allocation3 + $0x1], 0 }
   0x5   :  { %20 = vsyncpa [#allocation5], 0 }
   0x6   :  { %22 = vsyncpa [#allocation5 + $0x1], 0  ;;  %s1655_s17 = smov 0   ;;  %s1657_s18 = smov 0  }
   0x7   :  { %s1659_s19 = smov 0   ;;  %s1661_s20 = smov 0  }
   0x8 LB: > { %s1676_s21 = sadd.s32 4294967295, %s1588_s20   ;;  %s1282_s22 = sadd.s32 4294967294, %s1588_s20   ;;  %s1588_s20 = sphi %s1661_s20, %s1948_s20   ;;  %s1584_s19 = sphi %s1659_s19, %s1947_s19   ;;  %s1580_s18 = sphi %s1657_s18, %s1946_s18   ;;  %s1576_s17 = sphi %s1655_s17, %s1945_s17  }
   0x9   : > { %s1680_s23 = sadd.s32 1, %s1588_s20   ;;  %s265_s24 = sadd.s32 1, %s1584_s19 }
   0xa   : > { %s262_s25 = ssub.s32 %s1588_s20, %s1680_s23  ;;  %p275_p0 = scmp.ne.s32.totalorder %s1584_s19, %s1580_s18 }
   0xb   : > { %p263_p1 = scmp.eq.s32.totalorder %s262_s25, 0  ;;  %p276_p2 = scmp.eq.s32.totalorder %s1676_s21, 1 }
   0xc   : > { %p281_p3 = scmp.ne.s32.totalorder %s1580_s18, %s1576_s17  ;;  %p282_p4 = scmp.eq.s32.totalorder %s1282_s22, 1 }
   0xd   : > { %s1691_s26 = scalar_select %p263_p1, %s1584_s19, %s265_s24  }
   0xe   : > { %p1693_p5 = por %p276_p2, %p275_p0  ;;  %p1697_p6 = por %p282_p4, %p281_p3 }
   0xf   : > { %p1285_p7 = scmp.ge.s32.totalorder %s1588_s20, 1  ;;  %p370_p8 = scmp.lt.s32.totalorder %s1588_s20, 3 }
  0x11   : > { %p371_p9 = pnand %p1285_p7, %p370_p8 }
  0x12   : > { %p424_p10 = scmp.lt.s32.totalorder (!%p371_p9), %s1676_s21, 1  ;;  %v1590_v0 = vmov (!%p371_p9), 0.0   ;;  %vm1591_vm0 = vmmov (!%p371_p9), 0   ;;  %vm442_vm1 = vcmask (!%p371_p9), 261120   ;;  %s1941_s1 = sld [smem:[#allocation9_spill]] (!%p371_p9)  ;;  %vm558_vm2 = vcmask (!%p371_p9), 64512  }
  0x13   : > { %374 = sbr.rel (%p371_p9) target bundleno = 1135 (0x46f), region = 60  ;;  %1339 = vmatprep.subr.mxu0 (!%p371_p9), %v1590_v0  ;;  %1341 = vmatprep.mubr.msk.f32.mxu0 (!%p371_p9), %vm1591_vm0, %v1590_v0  ;;  %s1942_s0 = sld [smem:[#allocation8_spill]] (!%p371_p9)  ;;  %v739_v22 = vld [vmem:[%s1928_s5] sm:$0xff] (!%p371_p9)  ;;  %v740_v23 = vld [vmem:[%s1928_s5 + $0x8] sm:$0xff] (!%p371_p9)  ;;  %v1592_v24 = vmov (!%p371_p9), 0.0|0.0   ;;  %v741_v26 = vld [vmem:[%s1928_s5 + $0x10] sm:$0xff] (!%p371_p9) }
  0x14   : > { %1344 = vmatprep.subr.mxu1 (!%p371_p9), %v1590_v0  ;;  %1346 = vmatprep.mubr.msk.f32.mxu1 (!%p371_p9), %vm1591_vm0, %v1590_v0  ;;  %v1410_v25 = vpack.c.bf16 (!%p371_p9), %v740_v23, %v739_v22  ;;  %v742_v27 = vld [vmem:[%s1928_s5 + $0x18] sm:$0xff] (!%p371_p9)  ;;  %v735_v33 = vld [vmem:[%s1927_s4] sm:$0xff] (!%p371_p9)  ;;  %v736_v34 = vld [vmem:[%s1927_s4 + $0x8] sm:$0xff] (!%p371_p9)  ;;  %s1936_s24 = sshll.u32 (!%p371_p9), %s1676_s21, 7  ;;  %vm1126_vm3 = vcmask (!%p371_p9), 130048  }
  0x15   : > { %v1413_v28 = vpack.c.bf16 (!%p371_p9), %v742_v27, %v741_v26  ;;  %v1416_v36 = vpack.c.bf16 (!%p371_p9), %v736_v34, %v735_v33  ;;  %v737_v38 = vld [vmem:[%s1927_s4 + $0x10] sm:$0xff] (!%p371_p9)  ;;  %v738_v39 = vld [vmem:[%s1927_s4 + $0x18] sm:$0xff] (!%p371_p9)  ;;  %v968_v41 = vld [vmem:[%s1931_s8] sm:$0xff] (!%p371_p9) }
  0x16   : > { %v1419_v40 = vpack.c.bf16 (!%p371_p9), %v738_v39, %v737_v38  ;;  %v969_v42 = vld [vmem:[%s1931_s8 + $0x8] sm:$0xff] (!%p371_p9)  ;;  %v970_v44 = vld [vmem:[%s1931_s8 + $0x10] sm:$0xff] (!%p371_p9)  ;;  %v971_v45 = vld [vmem:[%s1931_s8 + $0x18] sm:$0xff] (!%p371_p9) }
  0x17   : > { %v1428_v43 = vpack.c.bf16 (!%p371_p9), %v969_v42, %v968_v41  ;;  %v1431_v46 = vpack.c.bf16 (!%p371_p9), %v971_v45, %v970_v44  ;;  %v886_v47 = vld [vmem:[%s1929_s6] sm:$0xff] (!%p371_p9)  ;;  %v887_v48 = vld [vmem:[%s1929_s6 + $0x8] sm:$0xff] (!%p371_p9)  ;;  %v888_v50 = vld [vmem:[%s1929_s6 + $0x10] sm:$0xff] (!%p371_p9) }
  0x18   : > { %v1422_v49 = vpack.c.bf16 (!%p371_p9), %v887_v48, %v886_v47  ;;  %v889_v51 = vld [vmem:[%s1929_s6 + $0x18] sm:$0xff] (!%p371_p9)  ;;  %v964_v55 = vld [vmem:[%s1930_s7] sm:$0xff] (!%p371_p9)  ;;  %v965_v56 = vld [vmem:[%s1930_s7 + $0x8] sm:$0xff] (!%p371_p9) }
  0x19   : > { %v1425_v54 = vpack.c.bf16 (!%p371_p9), %v889_v51, %v888_v50  ;;  %v1434_v57 = vpack.c.bf16 (!%p371_p9), %v965_v56, %v964_v55  ;;  %v966_v59 = vld [vmem:[%s1930_s7 + $0x10] sm:$0xff] (!%p371_p9)  ;;  %v967_v60 = vld [vmem:[%s1930_s7 + $0x18] sm:$0xff] (!%p371_p9) }
  0x1a   : > { %s425_s29 = scalar_select %p424_p10, %s1676_s21, 1  ;;  %v1437_v61 = vpack.c.bf16 %v967_v60, %v966_v59 }
  0x1c   : > { %s1288_s30 = sshll.u32 %s425_s29, 3 }
  0x1d   : > { %s431_s14 = scalar_lea.vmem %s1941_s1, %s1288_s30  ;;  %s427_s22 = scalar_lea.vmem %s1942_s0, %s1288_s30 }
  0x1e   : > { %v1717_v1 = vld [vmem:[%s431_s14] sm:$0xff]  ;;  %s437_s30 = scalar_lea.vmem %s1926_s3, %s425_s29  ;;  %s434_s14 = scalar_lea.vmem %s1925_s2, %s425_s29 }
  0x1f   : > { %1340 = vmatpush3.xpose.msk.msra.mxu0 %vm442_vm1, %v1717_v1  ;;  %v1721_v2 = vld [vmem:[%s427_s22] sm:$0xff]  ;;  %1345 = vmatpush3.msra.mxu1 %v1717_v1  ;;  %s1831_s29 = sand.u32 1, %s1580_s18  }
  0x20   : > { %1349 = vmatprep.subr.mxu1 %v1590_v0  ;;  %v1292_v5 = vld [vmem:[%s437_s30] ss:$0 sm:$0xff]  ;;  %1409 = vmatprep.subr.bf16.mxu0 %v1592_v24  ;;  %s1935_s15 = sshll.u32 %s1831_s29, 3  ;;  %s1130_s16 = scalar_lea.sflag [#allocation3], %s1831_s29 }
  0x21   : > { %v1293_v8 = vld [vmem:[%s434_s14] ss:$0 sm:$0xff]  ;;  %s416_s25 = scalar_lea.vmem [#allocation2], %s1935_s15  ;;  %s1845_s14 = scalar_lea.hbm %s1933_s10, %s1936_s24 }
  0x22   : > { %1342 = vmatmul.mubr.msk.f32.vlgmr.msra.gmra.mrb[0].mxu0 %vm442_vm1, %v1721_v2  ;;  %s1148_s30 = sshll.u32 %s416_s25, 4  ;;  %s1593_s15 = smov [#allocation2]   ;;  %s1847_s30 = int_to_ptr.vmem [resolvable:$true] %s1148_s30 }
  0x23   : > { %1362 = vmatprep.mubr.msk.f32.mxu0 %vm1591_vm0, %v1590_v0  ;;  %1411 = vmatpush3.bf16.msra.mxu0 %v1410_v25  ;;  %s1494_s22 = scalar_lea.vmem %s1847_s30, 128  ;;  %s1498_s0 = sshll.u32 %s1593_s15, 4  ;;  %s1499_s0 = int_to_ptr.vmem [resolvable:$false] %s1498_s0 }
  0x24   : > { %1412 = vmatprep.subr.bf16.mxu0 %v1592_v24  ;;  %p1495_p11 = scmp.ne.s32.totalorder %s1847_s30, %s1494_s22  ;;  %s1500_s12 = scalar_lea.vmem %s1499_s0, 256 }
  0x25   : > { %p1501_p0 = scmp.lt.s32.totalorder %s1847_s30, %s1499_s0  ;;  %p1502_p1 = scmp.lt.s32.totalorder %s1500_s12, %s1494_s22 }
  0x26   : > { %p1496_p12 = pnand %p1495_p11, %p1693_p5 }
  0x27   : > { %1414 = vmatpush3.bf16.msra.mxu0 %v1413_v28  ;;  %p1503_p2 = por %p1502_p1, %p1501_p0 }
  0x28   : > { %1421 = vmatprep.subr.bf16.mxu0 %v1592_v24  ;;  %p1497_p13 = pneg %p1496_p12 }
  0x2a   : > { %p1504_p3 = pnand %p1503_p2, %p1497_p13 }
  0xf5   : > { %v515_v3 = vpop.f32.mrb[0].mxu0 }
  0xf6   : > { %519 = vxpose.xlu0.b32.start.end [1/1] (short) (narrow) %v515_v3, 8  ;;  %v1343_v4 = vpop.f32.mrb[1].mxu0  ;;  %v557_v6 = vadd.f32 %v1292_v5, %v515_v3 }
  0xf8   : > { %v559_v7 = vsel %vm558_vm2, %v557_v6, -inf }
 0x123   : > { %560 = vmax.xlane.f32.xlu0 %v559_v7 }
 0x176   : > { %v535_v9 = vpop.trf.xlu0 }
 0x177   : > { %v576_v10 = vadd.f32 %v1293_v8, %v535_v9 }
 0x179   : > { %v577_v11 = vsel %vm558_vm2, %v576_v10, -inf }
 0x17a   : > { %578 = vmax.xlane.f32.xlu1 %v577_v11 }
 0x1b0   : > { %v561_v12 = vpop.xlane.xlu0 %560 }
 0x1b1   : > { %v562_v13 = vsub.f32 %v557_v6, %v561_v12 }
 0x1b3   : > { %v563_v14 = vmul.f32 1.442695, %v562_v13 }
 0x1b5   : > { %1486 = vpow2.f32 %v563_v14 }
 0x1bf   : > { %v1487_v15 = vpop.eup %1486 }
 0x1c0   : > { %v565_v16 = vsel %vm558_vm2, %v1487_v15, 0.0 }
 0x1c1   : > { %566 = vadd.xlane.f32.xlu1 %v565_v16 }
 0x207   : > { %v579_v17 = vpop.xlane.xlu1 %578 }
 0x208   : > { %v580_v18 = vsub.f32 %v576_v10, %v579_v17 }
 0x20a   : > { %v581_v19 = vmul.f32 1.442695, %v580_v18 }
 0x20c   : > { %1488 = vpow2.f32 %v581_v19 }
 0x216   : > { %v1489_v20 = vpop.eup %1488 }
 0x217   : > { %v583_v21 = vsel %vm558_vm2, %v1489_v20, 0.0 }
 0x218   : > { %584 = vadd.xlane.f32.xlu1 %v583_v21 }
 0x24e   : > { %v567_v29 = vpop.xlane.xlu1 %566 }
 0x24f   : > { %1490 = vrcp.f32 %v567_v29 }
 0x259   : > { %v1491_v30 = vpop.eup %1490 }
 0x25a   : > { %v569_v31 = vmul.f32 %v1491_v30, %v1487_v15 }
 0x25c   : > { %1347 = vmatmul.mubr.msk.f32.vlgmr.msra.gmra.mrb[0].mxu1 %vm558_vm2, %v569_v31 }
 0x25d   : > { %1350 = vmatpush3.msra.mxu1 %v1721_v2  ;;  %1351 = vmatprep.mubr.msk.f32.mxu1 %vm1591_vm0, %v1590_v0 }
 0x25e   : > { %1415 = vmatprep.subr.bf16.mxu1 %v1592_v24 }
 0x2a5   : > { %v585_v32 = vpop.xlane.xlu1 %584 }
 0x2a6   : > { %1492 = vrcp.f32 %v585_v32 }
 0x2b0   : > { %v1493_v35 = vpop.eup %1492 }
 0x2b1   : > { %v587_v37 = vmul.f32 %v1493_v35, %v1489_v20 }
 0x2b3   : > { %1352 = vmatmul.mubr.msk.f32.vlgmr.msra.gmra.mrb[2].mxu1 %vm558_vm2, %v587_v37 }
 0x2b4   : > { %1417 = vmatpush3.bf16.msra.mxu1 %v1416_v36  ;;  %1373 = vmatprep.mubr.msk.f32.mxu1 %vm1591_vm0, %v1590_v0 }
 0x2b5   : > { %1418 = vmatprep.subr.bf16.mxu1 %v1592_v24 }
 0x2b8   : > { %1420 = vmatpush3.bf16.msra.mxu1 %v1419_v40 }
 0x2b9   : > { %1427 = vmatprep.subr.bf16.mxu1 %v1592_v24 }
 0x2bb   : > { %1374 = vmatmul.mubr.msk.f32.vlgmr.msra.gmra.mrb[4].mxu1 %vm442_vm1, %v1721_v2 }
 0x2bc   : > { %1429 = vmatpush3.bf16.msra.mxu1 %v1428_v43  ;;  %1395 = vmatprep.mubr.msk.f32.mxu1 %vm1591_vm0, %v1590_v0 }
 0x2bd   : > { %1430 = vmatprep.subr.bf16.mxu1 %v1592_v24 }
 0x2c0   : > { %1432 = vmatpush3.bf16.msra.mxu1 %v1431_v46 }
 0x32f   : > { %v657_v52 = vpop.f32.mrb[0].mxu1 }
 0x330   : > { %v1348_v53 = vpop.f32.mrb[1].mxu1  ;;  %1363 = vmatmul.mubr.msk.f32.vlgmr.msra.gmra.mrb[2].mxu0 %vm442_vm1, %v657_v52  ;;  %v734_v58 = vmul.f32 %v657_v52, %v1721_v2 }
 0x331   : > { %1423 = vmatpush3.bf16.msra.mxu0 %v1422_v49  ;;  %1384 = vmatprep.mubr.msk.f32.mxu0 %vm1591_vm0, %v1590_v0 }
 0x332   : > { %1424 = vmatprep.subr.bf16.mxu0 %v1592_v24 }
 0x335   : > { %1426 = vmatpush3.bf16.msra.mxu0 %v1425_v54 }
 0x336   : > { %1433 = vmatprep.subr.bf16.mxu0 %v1592_v24 }
 0x338   : > { %1385 = vmatmul.mubr.msk.f32.vlgmr.msra.gmra.mrb[4].mxu0 %vm442_vm1, %v734_v58 }
 0x339   : > { %1435 = vmatpush3.bf16.msra.mxu0 %v1434_v57  ;;  %1406 = vmatprep.mubr.msk.f32.mxu0 %vm1591_vm0, %v1590_v0 }
 0x33a   : > { %1436 = vmatprep.subr.bf16.mxu0 %v1592_v24 }
 0x33d   : > { %1438 = vmatpush3.bf16.msra.mxu0 %v1437_v61 }
 0x340   : > { %1407 = vmatmul.mubr.msk.f32.vlgmr.msra.gmra.mrb[6].mxu0 %vm442_vm1, %v1717_v1  ;;  %v1301_v1 = vld [vmem:[%s1932_s9] ss:$0 sm:$0xff] }
 0x386   : > { %v730_v62 = vpop.f32.mrb[2].mxu1 }
 0x387   : > { %v1353_v63 = vpop.f32.mrb[3].mxu1  ;;  %1396 = vmatmul.mubr.msk.f32.vlgmr.msra.gmra.mrb[6].mxu1 %vm442_vm1, %v730_v62 }
 0x38e   : > { %v882_v2 = vpop.f32.mrb[4].mxu1 }
 0x38f   : > { %v1375_v3 = vpop.f32.mrb[5].mxu1 }
 0x403   : > { %v812_v4 = vpop.f32.mrb[2].mxu0 }
 0x404   : > { %v883_v5 = vadd.f32 %v882_v2, %v812_v4  ;;  %v1364_v6 = vpop.f32.mrb[3].mxu0 }
 0x40b   : > { %v959_v0 = vpop.f32.mrb[4].mxu0 }
 0x40c   : > { %v963_v7 = vadd.f32 %v959_v0, %v883_v5  ;;  %v1386_v8 = vpop.f32.mrb[5].mxu0 }
 0x40e   : > { %v1122_v9 = vadd.f32 %v1301_v1, %v963_v7 }
 0x410   : > { %v1123_v10 = vmax.f32 %v1122_v9, 0.0 }
 0x412   : > { %1127 = vst.msk [vmem:[%s416_s25] sm:$0xff] %vm1126_vm3, %v1123_v10 }
 0x413   : > { %v1111_v11 = vpop.f32.mrb[6].mxu0 }
 0x414   : > { %1507 = shalt.err (!%p1504_p3)
}
 0x415   : > { %s1508_s25 = scalar_lea.hbm %s1845_s14, 128  ;;  %s1512_s15 = scalar_lea.hbm %s1933_s10, 256 }
 0x416   : > { %p1509_p4 = scmp.ne.s32.totalorder %s1845_s14, %s1508_s25  ;;  %p1513_p9 = scmp.lt.u32.totalorder %s1845_s14, %s1933_s10 }
 0x417   : > { %p1514_p10 = scmp.lt.u32.totalorder %s1512_s15, %s1508_s25  ;;  %p1516_p12 = scmp.lt.u32.totalorder %s1508_s25, %s1845_s14 }
 0x418   : > { %p1510_p7 = pnand %p1509_p4, %p1693_p5 }
 0x419   : > { %p1515_p11 = por %p1514_p10, %p1513_p9 }
 0x41a   : > { %p1511_p8 = pneg %p1510_p7 }
 0x41b   : > { %p1517_p13 = por %p1516_p12, %p1515_p11 }
 0x41d   : > { %p1518_p0 = pnand %p1517_p13, %p1511_p8 }
 0x41f   : > { %1521 = shalt.err (!%p1518_p0)
}
 0x420   : > { %1439 = dma.vmem_to_hbm [thread:$0]  (%p1693_p5), %s1847_s30, 128, %s1845_s14, %s1130_s16   ;;  %v1408_v12 = vpop.f32.mrb[7].mxu0 }
 0x421   : > { %s1943_s1 = sshll.u32 %s1831_s29, 3  ;;  %s1944_s12 = sshll.u32 %s1676_s21, 7 }
 0x422   : > { %s423_s24 = scalar_lea.vmem [#allocation4], %s1943_s1  ;;  %s1879_s15 = scalar_lea.hbm %s1934_s11, %s1944_s12 }
 0x423   : > { %s1161_s22 = sshll.u32 %s423_s24, 4  ;;  %s1135_s30 = scalar_lea.sflag [#allocation5], %s1831_s29  ;;  %s1881_s22 = int_to_ptr.vmem [resolvable:$true] %s1161_s22 }
 0x424   : > { %s1522_s14 = scalar_lea.vmem %s1881_s22, 128  ;;  %s1594_s16 = smov [#allocation4]  }
 0x425   : > { %p1523_p1 = scmp.ne.s32.totalorder %s1881_s22, %s1522_s14  ;;  %s1526_s21 = sshll.u32 %s1594_s16, 4  ;;  %s1527_s21 = int_to_ptr.vmem [resolvable:$false] %s1526_s21 }
 0x426   : > { %s1528_s0 = scalar_lea.vmem %s1527_s21, 256  ;;  %p1529_p4 = scmp.lt.s32.totalorder %s1881_s22, %s1527_s21 }
 0x427   : > { %p1524_p2 = pnand %p1523_p1, %p1693_p5  ;;  %p1530_p7 = scmp.lt.s32.totalorder %s1528_s0, %s1522_s14 }
 0x429   : > { %p1525_p3 = pneg %p1524_p2  ;;  %p1531_p8 = por %p1530_p7, %p1529_p4 }
 0x42b   : > { %p1532_p9 = pnand %p1531_p8, %p1525_p3 }
 0x45a   : > { %v1041_v13 = vpop.f32.mrb[6].mxu1 }
 0x45b   : > { %v1112_v14 = vadd.f32 %v1111_v11, %v1041_v13  ;;  %v1397_v15 = vpop.f32.mrb[7].mxu1 }
 0x45d   : > { %v1124_v16 = vadd.f32 %v1301_v1, %v1112_v14 }
 0x45f   : > { %v1125_v17 = vmax.f32 %v1124_v16, 0.0 }
 0x461   : > { %1128 = vst.msk [vmem:[%s423_s24] sm:$0xff] %vm1126_vm3, %v1125_v17 }
 0x462   : > { %1535 = shalt.err (!%p1532_p9)
}
 0x463   : > { %s1536_s29 = scalar_lea.hbm %s1879_s15, 128  ;;  %s1540_s12 = scalar_lea.hbm %s1934_s11, 256 }
 0x464   : > { %p1537_p10 = scmp.ne.s32.totalorder %s1879_s15, %s1536_s29  ;;  %p1541_p13 = scmp.lt.u32.totalorder %s1879_s15, %s1934_s11 }
 0x465   : > { %p1542_p0 = scmp.lt.u32.totalorder %s1540_s12, %s1536_s29  ;;  %p1544_p2 = scmp.lt.u32.totalorder %s1536_s29, %s1879_s15 }
 0x466   : > { %p1538_p11 = pnand %p1537_p10, %p1693_p5 }
 0x467   : > { %p1543_p1 = por %p1542_p0, %p1541_p13 }
 0x468   : > { %p1539_p12 = pneg %p1538_p11 }
 0x469   : > { %p1545_p3 = por %p1544_p2, %p1543_p1 }
 0x46b   : > { %p1546_p4 = pnand %p1545_p3, %p1539_p12 }
 0x46d   : > { %1549 = shalt.err (!%p1546_p4)
}
 0x46e   : > { %1440 = dma.vmem_to_hbm [thread:$0]  (%p1693_p5), %s1881_s22, 128, %s1879_s15, %s1135_s30  }
 0x46f PF: > { %p1450_p7 = scmp.ge.s32.totalorder %s1588_s20, 2  ;;  %s1173_s14 = sand.u32 1, %s1576_s17  }
 0x470   : > { %s1174_s16 = scalar_lea.sflag [#allocation3], %s1173_s14 }
 0x471   : > { %p1444_p8 = pnand %p1450_p7, %p1697_p6 }
 0x473   : > { %1567 = dma.done.wait (!%p1444_p8), %s1174_s16, 128  }
 0x474   : > { %1569 = vsyncadd (!%p1444_p8), %s1174_s16, 4294967168  ;;  %s1183_s21 = scalar_lea.sflag [#allocation5], %s1173_s14 }
 0x475   : > { %1571 = dma.done.wait (!%p1444_p8), %s1183_s21, 128  }
 0x476   : > { %1573 = vsyncadd (!%p1444_p8), %s1183_s21, 4294967168  ;;  %p25_p5 = scmp.ge.s32.totalorder %s1680_s23, 4   ;;  %s1945_s17 = smov %s1580_s18 }
 0x477   : > { %s1946_s18 = smov %s1584_s19  ;;  %s1947_s19 = smov %s1691_s26 }
 0x478   : > { %s1948_s20 = smov %s1680_s23  ;;  %27 = sbr.rel (!%p25_p5) target bundleno = 8 (0x8), region = 121 }
 0x47f   :  { %1188 = vsyncpa [#allocation3], 1 }
 0x480   :  { %1190 = vsyncpa [#allocation3 + $0x1], 1 }
 0x481   :  { %1191 = vsyncpa [#allocation5], 1 }
 0x482   :  { %1193 = vsyncpa [#allocation5 + $0x1], 1 }

</bundles_post_ra>
